<compile_context>
chip_gen: v7x
topology: tpu7x:2x2x1
jax: 0.10.0
libtpu: 0.0.40
codegen_flags: <defaults>
</compile_context>

<pallas_src>
import functools

import jax
import jax.numpy as jnp
from jax.experimental import pallas as pl
from jax.experimental.pallas import tpu as pltpu


_VMEM = pl.BlockSpec(memory_space=pltpu.MemorySpace.VMEM)
_LANE = 128


def _round_up(x, m):
    return (x + m - 1) // m * m


def _vmem_capacity_bytes():
    """Per-chip VMEM capacity (v5e/v6e: 128 MiB, v7x: 64 MiB per TensorCore)."""
    try:
        return int(pltpu.get_tpu_info().vmem_capacity_bytes)
    except Exception:  # interpret mode / AOT on CPU / older runtimes
        return 64 * 1024 * 1024  # conservative: smallest per-TC VMEM (v7x)


# --------------------------------------------------------------------------
# Fused Pallas kernel: MLP stack + L2 normalize + cosine-similarity matmul
# --------------------------------------------------------------------------
def _fused_mlp_knn_kernel(x_ref, slab_ref, s_ref, emb_ref, *, layer_meta):
    """features -> Linear/ReLU stack -> L2-normalize -> S = Xn @ Xn.T.

    Activations live transposed as [P, N] (P = padded max layer width) so the
    node axis N rides the 128-lane axis (lane-dense).  All weights/biases come
    from ONE packed VMEM slab; each segment starts at a 128-lane-aligned
    offset, so every slice is a cheap within-tile static load.  Padded weight
    rows/cols are zero, so padded activation rows stay exactly 0 through ReLU,
    the L2 norm and the final similarity matmul.
    """
    nlayers = len(layer_meta)

    # Layer 0: contract W0 [P, isize] with x [N, isize] over the feature axis
    # directly — no explicit x.T (which was pure serial XLU latency in v2).
    w_off, b_off, in_dim = layer_meta[0]
    h = jax.lax.dot_general(
        slab_ref[:, w_off:w_off + in_dim], x_ref[...],
        (((1,), (1,)), ((), ())),
        preferred_element_type=jnp.float32,
    ) + slab_ref[:, b_off:b_off + 1]                              # [P, N]

    for li in range(1, nlayers):
        h = jnp.maximum(h, 0.0)                                   # ReLU (all but last layer)
        w_off, b_off, in_dim = layer_meta[li]
        h = jax.lax.dot_general(
            slab_ref[:, w_off:w_off + in_dim], h,
            (((1,), (0,)), ((), ())),
            preferred_element_type=jnp.float32,
        ) + slab_ref[:, b_off:b_off + 1]                          # [P, N]

    # Unnormalized embeddings (what the module returns), emitted lane-dense as
    # [P, N]; the wrapper does the tiny [P, N] -> [N, d_out] slice+transpose.
    emb_ref[...] = h.astype(emb_ref.dtype)

    # F.normalize(p=2, eps=1e-12) per node (per column in this layout):
    # x / max(||x||, eps) == x * rsqrt(max(sum x^2, eps^2)) -> one EUP rsqrt.
    sumsq = jnp.sum(h * h, axis=0, keepdims=True)                 # [1, N]
    hn = h * jax.lax.rsqrt(jnp.maximum(sumsq, 1e-24))             # [P, N]

    # Cosine similarity S = Xn @ Xn.T as a dim-0/dim-0 contraction of the
    # lane-dense operand (no hn.T materialization before the MXU push).
    s_ref[...] = jax.lax.dot_general(
        hn, hn, (((0,), (0,)), ((), ())),
        preferred_element_type=jnp.float32)                       # [N, N]


def fused_mlp_similarity(features, slab, meta):
    """One pallas_call for the whole hot path. Returns (sims [N,N], emb [N,d_out])."""
    p_pad, d_out, layer_meta = meta
    n, isize = features.shape

    slab_bytes = 4 * slab.shape[0] * slab.shape[1]
    vmem_needed = 4 * (n * n + p_pad * n + n * isize) + slab_bytes

    vmem_cap = _vmem_capacity_bytes()
    # TODO(synk): for large N, switch to a 2-D (row-block x col-block) grid,
    # fold the per-row top-(k+1) into the kernel (kills the N^2 HBM writeback)
    # and set dimension_semantics=("parallel", "parallel") so v7x's 2 TCs can
    # split the row blocks; with v7x's 64 MiB VMEM this must kick in roughly
    # 2x earlier in N than on v5e/v6e (128 MiB).
    assert 4 * vmem_needed < vmem_cap, (
        "fused un-tiled kernel would not fit comfortably in VMEM; tile it")
    vmem_limit = min(int(0.9 * vmem_cap),
                     max(4 * vmem_needed, 32 * 1024 * 1024))

    flops = (2 * n * sum(p_pad * m[2] for m in layer_meta)   # MLP matmuls
             + 2 * n * n * p_pad                             # similarity matmul
             + 6 * p_pad * n)                                # bias/ReLU/normalize
    cost = pl.CostEstimate(
        flops=int(flops),
        transcendentals=int(n),
        bytes_accessed=int(4 * (n * isize + n * n + p_pad * n) + slab_bytes))

    sims, emb_t = pl.pallas_call(
        functools.partial(_fused_mlp_knn_kernel, layer_meta=layer_meta),
        out_shape=(jax.ShapeDtypeStruct((n, n), jnp.float32),
                   jax.ShapeDtypeStruct((p_pad, n), jnp.float32)),
        in_specs=[_VMEM, _VMEM],
        out_specs=(_VMEM, _VMEM),
        compiler_params=pltpu.CompilerParams(vmem_limit_bytes=vmem_limit),
        cost_estimate=cost,
    )(features, slab)

    # Wrapper-side layout plumbing: keep the kernel output lane-dense and do
    # the tiny [P, N] -> [N, d_out] slice + transpose here.
    emb = emb_t[:d_out, :].T
    return sims, emb


# --------------------------------------------------------------------------
# Parameter init / packing (nn.Linear shapes)
# --------------------------------------------------------------------------
def init_mlp_learner_params(key, nlayers, isize):
    """Weights in PyTorch [out, in] layout; biases as [out, 1] columns.

    NOTE: the original module's nlayers > 2 configuration
    (Linear(isize, isize//4) followed by Linear(isize, isize)) is shape-
    inconsistent and cannot run a forward pass in PyTorch either, so only
    nlayers in {1, 2} is supported here.
    """
    if nlayers == 1:
        dims = [(isize, isize)]
    elif nlayers == 2:
        dims = [(isize, isize // 4), (isize // 4, isize // 8)]
    else:
        raise ValueError(
            "MLP_learner's forward is only shape-consistent for nlayers in {1, 2}")
    params = []
    for fan_in, fan_out in dims:
        kw, kb, key = jax.random.split(key, 3)
        bound = 1.0 / float(fan_in) ** 0.5
        w = jax.random.uniform(kw, (fan_out, fan_in), jnp.float32, -bound, bound)
        b = jax.random.uniform(kb, (fan_out, 1), jnp.float32, -bound, bound)
        params.append((w, b))
    return params


def pack_mlp_learner_params(params):
    """Pack all (zero-padded) weights & biases into ONE [P, L] f32 slab so the
    kernel sees a single parameter DMA instead of 2*nlayers tiny ones.

    Each weight / bias segment starts at a 128-lane-aligned offset (so every
    in-kernel slice is a within-tile static load).  Returns (slab, meta) where
    meta is static Python data: (p_pad, d_out, ((w_off, b_off, in_dim), ...)).
    """
    p_pad = _round_up(max(w.shape[0] for w, _ in params), 8)
    d_out = params[-1][0].shape[0]

    layer_meta = []
    off = 0
    for li, (w, _) in enumerate(params):
        in_dim = w.shape[1] if li == 0 else p_pad
        w_off = off
        b_off = w_off + _round_up(in_dim, _LANE)
        off = b_off + _LANE
        layer_meta.append((w_off, b_off, in_dim))

    slab = jnp.zeros((p_pad, off), jnp.float32)
    for (w, b), (w_off, b_off, _) in zip(params, layer_meta):
        out_i, in_i = w.shape
        slab = slab.at[:out_i, w_off:w_off + in_i].set(w)
        slab = slab.at[:out_i, b_off:b_off + 1].set(b)
    return slab, (p_pad, d_out, tuple(layer_meta))


# --------------------------------------------------------------------------
# MLP_learner.forward
# --------------------------------------------------------------------------
def mlp_learner_forward(slab, features, *, meta, k):
    """Returns (edge_index, edge_weight, embeddings), mirroring MLP_learner.forward."""
    sims, embeddings = fused_mlp_similarity(features, slab, meta)
    n = sims.shape[0]

    # knn_fast glue (block size 1000 is a no-op for N < 1000): per-row
    # top-(k+1) + symmetric degree normalization.
    # TODO(synk): if the project-local knn_fast symmetrizes edges
    # (cat((rows,cols),(cols,rows))), add that concat here; variants differ
    # only there.
    vals, inds = jax.lax.top_k(sims, k + 1)                       # [N, k+1]
    rows = jnp.repeat(jnp.arange(n, dtype=jnp.int32), k + 1)
    cols = inds.reshape(-1).astype(jnp.int32)
    values = vals.reshape(-1)
    norm_row = jnp.sum(vals, axis=1)                              # [N]
    # Dense one-hot matmul replaces the (effectively serial) TPU scatter-add
    # that index_add_ would lower to.
    norm_col = jnp.matmul(values, jax.nn.one_hot(cols, n, dtype=values.dtype))
    norm = norm_row + norm_col
    # TODO(synk): reference knn_fast uses pow(norm, -0.5) directly; negative
    # cosine-sum norms would NaN there too — kept to match reference semantics.
    edge_weight = values * jax.lax.rsqrt(norm[rows]) * jax.lax.rsqrt(norm[cols])
    edge_index = jnp.stack([rows, cols], axis=0)
    return edge_index, edge_weight, embeddings


# --------------------------------------------------------------------------
if __name__ == "__main__":
    N, ISIZE, NLAYERS, K = 128, 32, 2, 4

    key = jax.random.PRNGKey(0)
    key_x, key_p = jax.random.split(key)
    features = jax.random.normal(key_x, (N, ISIZE), jnp.float32)
    params = init_mlp_learner_params(key_p, NLAYERS, ISIZE)
    slab, meta = pack_mlp_learner_params(params)   # one packed parameter DMA

    fwd = jax.jit(functools.partial(mlp_learner_forward, meta=meta, k=K))
    edge_index, edge_weight, embeddings = fwd(slab, features)
    jax.block_until_ready((edge_index, edge_weight, embeddings))

    assert edge_index.shape == (2, N * (K + 1))
    assert edge_weight.shape == (N * (K + 1),)
    assert embeddings.shape == (N, ISIZE // 8)
    assert bool(jnp.isfinite(embeddings).all())
    print("KERNEL_OK")
</pallas_src>

<mosaic_0001>
module attributes {stable_mosaic.version = 11 : i64} {
  func.func @_fused_mlp_knn_kernel(%arg0: memref<128x32xf32, #tpu.memory_space<vmem>>, %arg1: memref<8x512xf32, #tpu.memory_space<vmem>>, %arg2: memref<128x128xf32, #tpu.memory_space<vmem>>, %arg3: memref<8x128xf32, #tpu.memory_space<vmem>>) attributes {dimension_semantics = [], scalar_prefetch = 0 : i64, scratch_operands = 0 : i64, tpu.core_type = #tpu.core_type<tc>} {
    %c0 = arith.constant 0 : index
    %c0_0 = arith.constant 0 : index
    %0 = vector.load %arg1[%c0, %c0_0] : memref<8x512xf32, #tpu.memory_space<vmem>>, vector<8x32xf32>
    %c0_1 = arith.constant 0 : index
    %c0_2 = arith.constant 0 : index
    %1 = vector.load %arg0[%c0_1, %c0_2] : memref<128x32xf32, #tpu.memory_space<vmem>>, vector<128x32xf32>
    %cst = arith.constant dense<0.000000e+00> : vector<8x128xf32>
    %2 = tpu.matmul %0, %1, %cst {dimension_numbers = #tpu.dot_dimension_numbers<[1], [1], [0], [0], [0, 0, 1, 0], [], []>} : vector<8x32xf32>, vector<128x32xf32>, vector<8x128xf32> -> vector<8x128xf32>
    %c0_3 = arith.constant 0 : index
    %c128 = arith.constant 128 : index
    %3 = vector.load %arg1[%c0_3, %c128] : memref<8x512xf32, #tpu.memory_space<vmem>>, vector<8x1xf32>
    %4 = vector.broadcast %3 : vector<8x1xf32> to vector<8x128xf32>
    %5 = arith.addf %2, %4 : vector<8x128xf32>
    %cst_4 = arith.constant 0.000000e+00 : f32
    %6 = vector.broadcast %cst_4 : f32 to vector<8x128xf32>
    %7 = arith.maximumf %5, %6 : vector<8x128xf32>
    %c0_5 = arith.constant 0 : index
    %c256 = arith.constant 256 : index
    %8 = vector.load %arg1[%c0_5, %c256] : memref<8x512xf32, #tpu.memory_space<vmem>>, vector<8x8xf32>
    %cst_6 = arith.constant dense<0.000000e+00> : vector<8x128xf32>
    %9 = tpu.matmul %8, %7, %cst_6 {dimension_numbers = #tpu.dot_dimension_numbers<[1], [0], [0], [1], [0, 0, 1, 1], [], []>} : vector<8x8xf32>, vector<8x128xf32>, vector<8x128xf32> -> vector<8x128xf32>
    %c0_7 = arith.constant 0 : index
    %c384 = arith.constant 384 : index
    %10 = vector.load %arg1[%c0_7, %c384] : memref<8x512xf32, #tpu.memory_space<vmem>>, vector<8x1xf32>
    %11 = vector.broadcast %10 : vector<8x1xf32> to vector<8x128xf32>
    %12 = arith.addf %9, %11 : vector<8x128xf32>
    %c0_8 = arith.constant 0 : index
    %c0_9 = arith.constant 0 : index
    %13 = vector.load %arg3[%c0_8, %c0_9] : memref<8x128xf32, #tpu.memory_space<vmem>>, vector<8x128xf32>
    tpu.vector_store %arg3[%c0_8, %c0_9], %12 {strides = array<i32>} : memref<8x128xf32, #tpu.memory_space<vmem>>, vector<8x128xf32>,
    %14 = arith.mulf %12, %12 : vector<8x128xf32>
    %cst_10 = arith.constant dense<0.000000e+00> : vector<128xf32>
    %15 = vector.multi_reduction <add>, %14, %cst_10 [0] : vector<8x128xf32> to vector<128xf32>
    %16 = vector.shape_cast %15 : vector<128xf32> to vector<1x128xf32>
    %cst_11 = arith.constant 1.000000e-24 : f32
    %17 = vector.broadcast %cst_11 : f32 to vector<1x128xf32>
    %18 = arith.maximumf %16, %17 : vector<1x128xf32>
    %19 = math.rsqrt %18 : vector<1x128xf32>
    %20 = vector.broadcast %19 : vector<1x128xf32> to vector<8x128xf32>
    %21 = arith.mulf %12, %20 : vector<8x128xf32>
    %cst_12 = arith.constant dense<0.000000e+00> : vector<128x128xf32>
    %22 = tpu.matmul %21, %21, %cst_12 {dimension_numbers = #tpu.dot_dimension_numbers<[0], [0], [1], [1], [0, 1, 1, 1], [], []>} : vector<8x128xf32>, vector<8x128xf32>, vector<128x128xf32> -> vector<128x128xf32>
    %c0_13 = arith.constant 0 : index
    %c0_14 = arith.constant 0 : index
    %23 = vector.load %arg2[%c0_13, %c0_14] : memref<128x128xf32, #tpu.memory_space<vmem>>, vector<128x128xf32>
    tpu.vector_store %arg2[%c0_13, %c0_14], %22 {strides = array<i32>} : memref<128x128xf32, #tpu.memory_space<vmem>>, vector<128x128xf32>,
    return
  }
}

</mosaic_0001>

<bundles_post_ra>
// kernel: eq.1
= control target key start
LH: loop header
LB: loop body
LE: loop exit
PB: predicated region body
PF: predicated region fallthrough
CT: control target
= control target key end

     0   :  { %vm9_vm0 = vcmask 7168   ;;  %vm27_vm1 = vcmask 23552   ;;  %vm23_vm2 = vcmask 15360   ;;  %vm13_vm3 = vcmask 31744   ;;  %s1261_s18 = smov 127   ;;  %s1262_s23 = smov 125   ;;  %s2198_s0 = inlined_call_operand.vmem [shape: s32[128,5], index: 0, kind: input, shape index: {}]   ;;  %s2199_s1 = inlined_call_operand.vmem [shape: s32[640], index: 1, kind: output, shape index: {}]  }
   0x1   :  { %v897_v0 = vld [vmem:[%s2198_s0 + $0x33] sm:$0x1]   ;;  %v905_v2 = vld [vmem:[%s2198_s0 + $0x19] sm:$0x1]   ;;  %v901_v5 = vld [vmem:[%s2198_s0 + $0x66] sm:$0x1]  }
   0x2   :  { %v898_v1 = vld [vmem:[%s2198_s0 + $0x33] sm:$0x1]   ;;  %v906_v4 = vld [vmem:[%s2198_s0 + $0x19] sm:$0x1]   ;;  %v902_v6 = vld [vmem:[%s2198_s0 + $0x66] sm:$0x1]  }
   0x3   :  { %v10_v3 = vsel %vm9_vm0, %v898_v1, %v897_v0  ;;  %v38_v7 = vsel %vm27_vm1, %v906_v4, %v905_v2  ;;  %v908_v8 = vld [vmem:[%s2198_s0 + $0x4c] sm:$0x1]   ;;  %v24_v10 = vsel %vm23_vm2, %v902_v6, %v901_v5  ;;  %s1263_s24 = smov 126   ;;  %s1264_s25 = smov 124   ;;  %v912_v12 = vld [vmem:[%s2198_s0 + $0x7f] sm:$0x1]  }
   0x4   :  { %11 = vrot.lane.b32.xlu0 %v10_v3, %s1261_s18  ;;  %v909_v9 = vld [vmem:[%s2198_s0 + $0x4c] sm:$0x1]   ;;  %39 = vrot.lane.b32.xlu1 %v38_v7, %s1262_s23  ;;  %v914_v13 = vld [vmem:[%s2198_s0 + $0x32] sm:$0x1]   ;;  %s1265_s30 = smov 123   ;;  %s1266_s2 = smov 122  }
   0x5   :  { %v51_v11 = vsel %vm13_vm3, %v909_v9, %v908_v8  ;;  %v916_v14 = vld [vmem:[%s2198_s0 + $0x65] sm:$0x1]   ;;  %v918_v15 = vld [vmem:[%s2198_s0 + $0x18] sm:$0x1]   ;;  %s1267_s7 = smov 121   ;;  %s1268_s8 = smov 120  }
   0x6   :  { %v919_v16 = vld [vmem:[%s2198_s0 + $0x4b] sm:$0x1]   ;;  %v921_v17 = vld [vmem:[%s2198_s0 + $0x7e] sm:$0x1]   ;;  %s1269_s13 = smov 119   ;;  %s1270_s14 = smov 118  }
   0x7   :  { %v923_v18 = vld [vmem:[%s2198_s0 + $0x31] sm:$0x1]   ;;  %v925_v19 = vld [vmem:[%s2198_s0 + $0x64] sm:$0x1]   ;;  %s1271_s19 = smov 117   ;;  %s1272_s20 = smov 116  }
   0x8   :  { %25 = vrot.lane.b32.xlu0 %v24_v10, %s1263_s24  ;;  %52 = vrot.lane.b32.xlu1 %v51_v11, %s1264_s25  ;;  %v927_v20 = vld [vmem:[%s2198_s0 + $0x17] sm:$0x1]   ;;  %v928_v21 = vld [vmem:[%s2198_s0 + $0x4a] sm:$0x1]   ;;  %s1273_s25 = smov 115   ;;  %s1274_s26 = smov 114  }
   0x9   :  { %v930_v22 = vld [vmem:[%s2198_s0 + $0x7d] sm:$0x1]   ;;  %v932_v23 = vld [vmem:[%s2198_s0 + $0x30] sm:$0x1]   ;;  %vm3_vm4 = vcmask 39936   ;;  %s1276_s3 = smov 112  }
   0xa   :  { %v934_v24 = vld [vmem:[%s2198_s0 + $0x63] sm:$0x1]   ;;  %v2_v25 = vld [vmem:[%s2198_s0] sm:$0x1]   ;;  %v936_v26 = vld [vmem:[%s2198_s0 + $0x16] sm:$0x1]  }
   0xb   :  { %4 = vst.msk [vmem:[%s2199_s1] sm:$0x1] %vm3_vm4, %v2_v25   ;;  %s1277_s12 = smov 111   ;;  %v937_v27 = vld [vmem:[%s2198_s0 + $0x49] sm:$0x1]   ;;  %s1279_s18 = smov 109  }
   0xc   :  { %62 = vrot.lane.b32.xlu0 %v912_v12, %s1265_s30  ;;  %69 = vrot.lane.b32.xlu1 %v914_v13, %s1266_s2  ;;  %s1275_s2 = smov 113   ;;  %v939_v28 = vld [vmem:[%s2198_s0 + $0x7c] sm:$0x1]   ;;  %v941_v29 = vld [vmem:[%s2198_s0 + $0x2f] sm:$0x1]   ;;  %s1281_s24 = smov 107  }
   0xd   :  { %v943_v30 = vld [vmem:[%s2198_s0 + $0x62] sm:$0x1]   ;;  %v945_v31 = vld [vmem:[%s2198_s0 + $0x15] sm:$0x1]   ;;  %v946_v32 = vld [vmem:[%s2198_s0 + $0x48] sm:$0x1]  }
   0xe   :  { %s1283_s30 = smov 105   ;;  %v948_v33 = vld [vmem:[%s2198_s0 + $0x7b] sm:$0x1]   ;;  %v950_v34 = vld [vmem:[%s2198_s0 + $0x2e] sm:$0x1]   ;;  %s1296_s9 = smov 92  }
   0xf   :  { %v952_v35 = vld [vmem:[%s2198_s0 + $0x61] sm:$0x1]   ;;  %v954_v36 = vld [vmem:[%s2198_s0 + $0x14] sm:$0x1]   ;;  %v955_v37 = vld [vmem:[%s2198_s0 + $0x47] sm:$0x1]  }
  0x10   :  { %76 = vrot.lane.b32.xlu0 %v916_v14, %s1267_s7  ;;  %83 = vrot.lane.b32.xlu1 %v918_v15, %s1268_s8  ;;  %s1285_s7 = smov 103   ;;  %s1286_s8 = smov 102   ;;  %v957_v38 = vld [vmem:[%s2198_s0 + $0x7a] sm:$0x1]   ;;  %v959_v39 = vld [vmem:[%s2198_s0 + $0x2d] sm:$0x1]  }
  0x11   :  { %v961_v40 = vld [vmem:[%s2198_s0 + $0x60] sm:$0x1]   ;;  %v963_v41 = vld [vmem:[%s2198_s0 + $0x13] sm:$0x1]   ;;  %v964_v42 = vld [vmem:[%s2198_s0 + $0x46] sm:$0x1]  }
  0x12   :  { %v966_v43 = vld [vmem:[%s2198_s0 + $0x79] sm:$0x1]   ;;  %v968_v44 = vld [vmem:[%s2198_s0 + $0x2c] sm:$0x1]   ;;  %v970_v45 = vld [vmem:[%s2198_s0 + $0x5f] sm:$0x1]  }
  0x13   :  { %v972_v46 = vld [vmem:[%s2198_s0 + $0x12] sm:$0x1]   ;;  %s1298_s15 = smov 90   ;;  %v973_v47 = vld [vmem:[%s2198_s0 + $0x45] sm:$0x1]   ;;  %s1300_s21 = smov 88  }
  0x14   :  { %89 = vrot.lane.b32.xlu0 %v919_v16, %s1269_s13  ;;  %96 = vrot.lane.b32.xlu1 %v921_v17, %s1270_s14  ;;  %s1278_s13 = smov 110   ;;  %s1288_s14 = smov 100   ;;  %v975_v48 = vld [vmem:[%s2198_s0 + $0x78] sm:$0x1]   ;;  %v977_v49 = vld [vmem:[%s2198_s0 + $0x2b] sm:$0x1]  }
  0x15   :  { %v979_v50 = vld [vmem:[%s2198_s0 + $0x5e] sm:$0x1]   ;;  %s1302_s27 = smov 86   ;;  %v981_v51 = vld [vmem:[%s2198_s0 + $0x11] sm:$0x1]   ;;  %s1304_s4 = smov 84  }
  0x16   :  { %v982_v52 = vld [vmem:[%s2198_s0 + $0x44] sm:$0x1]   ;;  %v984_v53 = vld [vmem:[%s2198_s0 + $0x77] sm:$0x1]   ;;  %v986_v54 = vld [vmem:[%s2198_s0 + $0x2a] sm:$0x1]  }
  0x17   :  { %s1306_s10 = smov 82   ;;  %v988_v55 = vld [vmem:[%s2198_s0 + $0x5d] sm:$0x1]   ;;  %v990_v56 = vld [vmem:[%s2198_s0 + $0x10] sm:$0x1]   ;;  %s1308_s16 = smov 80  }
  0x18   :  { %103 = vrot.lane.b32.xlu0 %v923_v18, %s1271_s19  ;;  %110 = vrot.lane.b32.xlu1 %v925_v19, %s1272_s20  ;;  %s1280_s19 = smov 108   ;;  %s1290_s20 = smov 98   ;;  %v991_v57 = vld [vmem:[%s2198_s0 + $0x43] sm:$0x1]   ;;  %v993_v58 = vld [vmem:[%s2198_s0 + $0x76] sm:$0x1]  }
  0x19   :  { %s1310_s22 = smov 78   ;;  %v995_v59 = vld [vmem:[%s2198_s0 + $0x29] sm:$0x1]   ;;  %v997_v60 = vld [vmem:[%s2198_s0 + $0x5c] sm:$0x1]   ;;  %s1312_s28 = smov 76  }
  0x1a   :  { %v999_v61 = vld [vmem:[%s2198_s0 + $0xf] sm:$0x1]   ;;  %v1000_v62 = vld [vmem:[%s2198_s0 + $0x42] sm:$0x1]   ;;  %s1314_s5 = smov 74   ;;  %s1316_s11 = smov 72  }
  0x1b   :  { %v1002_v63 = vld [vmem:[%s2198_s0 + $0x75] sm:$0x1]   ;;  %v1004_v0 = vld [vmem:[%s2198_s0 + $0x28] sm:$0x1]   ;;  %v1006_v1 = vld [vmem:[%s2198_s0 + $0x5b] sm:$0x1]  }
  0x1c   :  { %117 = vrot.lane.b32.xlu0 %v927_v20, %s1273_s25  ;;  %123 = vrot.lane.b32.xlu1 %v928_v21, %s1274_s26  ;;  %s1282_s25 = smov 106   ;;  %s1292_s26 = smov 96   ;;  %v1008_v2 = vld [vmem:[%s2198_s0 + $0xe] sm:$0x1]   ;;  %vm16_vm5 = vcmask 1048568   ;;  %vm44_vm6 = vcmask 1048552  }
  0x1d   :  { %s1318_s17 = smov 70   ;;  %v1009_v3 = vld [vmem:[%s2198_s0 + $0x41] sm:$0x1]   ;;  %v1011_v5 = vld [vmem:[%s2198_s0 + $0x74] sm:$0x1]   ;;  %vm30_vm7 = vcmask 1048560  }
  0x1e   :  { %v1013_v7 = vld [vmem:[%s2198_s0 + $0x27] sm:$0x1]   ;;  %vm57_vm8 = vcmask 1048544   ;;  %v1015_v9 = vld [vmem:[%s2198_s0 + $0x5a] sm:$0x1]   ;;  %vm64_vm9 = vcmask 1048536  }
  0x1f   :  { %v1017_v11 = vld [vmem:[%s2198_s0 + $0xd] sm:$0x1]   ;;  %vm71_vm10 = vcmask 1040336   ;;  %v1018_v13 = vld [vmem:[%s2198_s0 + $0x40] sm:$0x1]   ;;  %s1323_s23 = smov 65  }
  0x20   :  { %130 = vrot.lane.b32.xlu0 %v930_v22, %s1275_s2  ;;  %137 = vrot.lane.b32.xlu1 %v932_v23, %s1276_s3  ;;  %s1284_s2 = smov 104   ;;  %s1294_s3 = smov 94   ;;  %vm78_vm11 = vcmask 1032136   ;;  %v1020_v15 = vld [vmem:[%s2198_s0 + $0x73] sm:$0x1]   ;;  %vm85_vm12 = vcmask 1023936  }
  0x21   :  { %v1022_v17 = vld [vmem:[%s2198_s0 + $0x26] sm:$0x1]   ;;  %vm91_vm13 = vcmask 1015736   ;;  %v1024_v19 = vld [vmem:[%s2198_s0 + $0x59] sm:$0x1]   ;;  %vm98_vm14 = vcmask 1007536  }
  0x22   :  { %v1026_v21 = vld [vmem:[%s2198_s0 + $0xc] sm:$0x1]   ;;  %vm105_vm15 = vcmask 999336   ;;  %v1027_v23 = vld [vmem:[%s2198_s0 + $0x3f] sm:$0x1]   ;;  %vm139_vm4 = vcmask 958336  }
  0x23   :  { %v1029_v25 = vld [vmem:[%s2198_s0 + $0x72] sm:$0x1]   ;;  %s1337_s6 = smov 51   ;;  %s1342_s29 = smov 46  }
  0x24   :  { %144 = vrot.lane.b32.xlu0 %v934_v24, %s1277_s12  ;;  %151 = vrot.lane.b32.xlu1 %v936_v26, %s1278_s13  ;;  %s1287_s13 = smov 101   ;;  %s1356_s12 = smov 32  }
  0x28   :  { %157 = vrot.lane.b32.xlu0 %v937_v27, %s1279_s18  ;;  %164 = vrot.lane.b32.xlu1 %v939_v28, %s1280_s19  ;;  %s1289_s19 = smov 99   ;;  %v1031_v27 = vld [vmem:[%s2198_s0 + $0x25] sm:$0x1]   ;;  %s1334_s18 = smov 54  }
  0x2c   :  { %171 = vrot.lane.b32.xlu0 %v941_v29, %s1281_s24  ;;  %178 = vrot.lane.b32.xlu1 %v943_v30, %s1282_s25  ;;  %s1291_s25 = smov 97   ;;  %s1329_s24 = smov 59   ;;  %v1033_v29 = vld [vmem:[%s2198_s0 + $0x58] sm:$0x1]  }
  0x30   :  { %185 = vrot.lane.b32.xlu0 %v945_v31, %s1283_s30  ;;  %191 = vrot.lane.b32.xlu1 %v946_v32, %s1284_s2  ;;  %s1293_s2 = smov 95   ;;  %v1035_v31 = vld [vmem:[%s2198_s0 + $0xb] sm:$0x1]   ;;  %s1348_s30 = smov 40  }
  0x34   :  { %198 = vrot.lane.b32.xlu0 %v948_v33, %s1285_s7  ;;  %205 = vrot.lane.b32.xlu1 %v950_v34, %s1286_s8  ;;  %s1295_s8 = smov 93   ;;  %s1326_s7 = smov 62   ;;  %v1036_v33 = vld [vmem:[%s2198_s0 + $0x3e] sm:$0x1]  }
  0x38   :  { %212 = vrot.lane.b32.xlu0 %v952_v35, %s1287_s13  ;;  %219 = vrot.lane.b32.xlu1 %v954_v36, %s1288_s14  ;;  %s1297_s14 = smov 91   ;;  %v1038_v35 = vld [vmem:[%s2198_s0 + $0x71] sm:$0x1]   ;;  %s1362_s13 = smov 26  }
  0x3c   :  { %225 = vrot.lane.b32.xlu0 %v955_v37, %s1289_s19  ;;  %232 = vrot.lane.b32.xlu1 %v957_v38, %s1290_s20  ;;  %s1299_s20 = smov 89   ;;  %v1040_v37 = vld [vmem:[%s2198_s0 + $0x24] sm:$0x1]   ;;  %s1340_s19 = smov 48  }
  0x40   :  { %239 = vrot.lane.b32.xlu0 %v959_v39, %s1291_s25  ;;  %246 = vrot.lane.b32.xlu1 %v961_v40, %s1292_s26  ;;  %s1301_s26 = smov 87   ;;  %s1335_s25 = smov 53   ;;  %v1042_v39 = vld [vmem:[%s2198_s0 + $0x57] sm:$0x1]  }
  0x44   :  { %253 = vrot.lane.b32.xlu0 %v963_v41, %s1293_s2  ;;  %259 = vrot.lane.b32.xlu1 %v964_v42, %s1294_s3  ;;  %s1303_s3 = smov 85   ;;  %s1320_s2 = smov 68   ;;  %v1044_v41 = vld [vmem:[%s2198_s0 + $0xa] sm:$0x1]  }
  0x48   :  { %266 = vrot.lane.b32.xlu0 %v966_v43, %s1295_s8  ;;  %273 = vrot.lane.b32.xlu1 %v968_v44, %s1296_s9  ;;  %s1305_s9 = smov 83   ;;  %s1332_s8 = smov 56   ;;  %v1045_v43 = vld [vmem:[%s2198_s0 + $0x3d] sm:$0x1]  }
  0x4c   :  { %280 = vrot.lane.b32.xlu0 %v970_v45, %s1297_s14  ;;  %287 = vrot.lane.b32.xlu1 %v972_v46, %s1298_s15  ;;  %s1307_s15 = smov 81   ;;  %s1327_s14 = smov 61   ;;  %v1047_v45 = vld [vmem:[%s2198_s0 + $0x70] sm:$0x1]  }
  0x50   :  { %293 = vrot.lane.b32.xlu0 %v973_v47, %s1299_s20  ;;  %300 = vrot.lane.b32.xlu1 %v975_v48, %s1300_s21  ;;  %s1309_s21 = smov 79   ;;  %v1049_v47 = vld [vmem:[%s2198_s0 + $0x23] sm:$0x1]   ;;  %s1346_s20 = smov 42  }
  0x54   :  { %307 = vrot.lane.b32.xlu0 %v977_v49, %s1301_s26  ;;  %314 = vrot.lane.b32.xlu1 %v979_v50, %s1302_s27  ;;  %s1311_s27 = smov 77   ;;  %s1319_s26 = smov 69   ;;  %v1051_v49 = vld [vmem:[%s2198_s0 + $0x56] sm:$0x1]  }
  0x58   :  { %321 = vrot.lane.b32.xlu0 %v981_v51, %s1303_s3  ;;  %327 = vrot.lane.b32.xlu1 %v982_v52, %s1304_s4  ;;  %s1313_s4 = smov 75   ;;  %v1053_v51 = vld [vmem:[%s2198_s0 + $0x9] sm:$0x1]   ;;  %s1360_s3 = smov 28  }
  0x5c   :  { %334 = vrot.lane.b32.xlu0 %v984_v53, %s1305_s9  ;;  %341 = vrot.lane.b32.xlu1 %v986_v54, %s1306_s10  ;;  %s1315_s10 = smov 73   ;;  %s1338_s9 = smov 50   ;;  %v1054_v53 = vld [vmem:[%s2198_s0 + $0x3c] sm:$0x1]  }
  0x60   :  { %348 = vrot.lane.b32.xlu0 %v988_v55, %s1307_s15  ;;  %355 = vrot.lane.b32.xlu1 %v990_v56, %s1308_s16  ;;  %s1317_s16 = smov 71   ;;  %s1333_s15 = smov 55   ;;  %v1056_v55 = vld [vmem:[%s2198_s0 + $0x6f] sm:$0x1]  }
  0x64   :  { %361 = vrot.lane.b32.xlu0 %v991_v57, %s1309_s21  ;;  %368 = vrot.lane.b32.xlu1 %v993_v58, %s1310_s22  ;;  %v1058_v57 = vld [vmem:[%s2198_s0 + $0x22] sm:$0x1]   ;;  %s1352_s21 = smov 36   ;;  %s1358_s22 = smov 30  }
  0x68   :  { %375 = vrot.lane.b32.xlu0 %v995_v59, %s1311_s27  ;;  %382 = vrot.lane.b32.xlu1 %v997_v60, %s1312_s28  ;;  %s1330_s27 = smov 58   ;;  %s1336_s28 = smov 52   ;;  %v1060_v59 = vld [vmem:[%s2198_s0 + $0x55] sm:$0x1]  }
  0x6c   :  { %389 = vrot.lane.b32.xlu0 %v999_v61, %s1313_s4  ;;  %395 = vrot.lane.b32.xlu1 %v1000_v62, %s1314_s5  ;;  %s1325_s4 = smov 63   ;;  %s1331_s5 = smov 57   ;;  %v1062_v61 = vld [vmem:[%s2198_s0 + $0x8] sm:$0x1]  }
  0x70   :  { %402 = vrot.lane.b32.xlu0 %v1002_v63, %s1315_s10  ;;  %409 = vrot.lane.b32.xlu1 %v1004_v0, %s1316_s11  ;;  %s1321_s11 = smov 67   ;;  %s1344_s10 = smov 44   ;;  %v1063_v63 = vld [vmem:[%s2198_s0 + $0x3b] sm:$0x1]  }
  0x74   :  { %416 = vrot.lane.b32.xlu0 %v1006_v1, %s1317_s16  ;;  %423 = vrot.lane.b32.xlu1 %v1008_v2, %s1318_s17  ;;  %s1322_s16 = smov 66   ;;  %s1328_s17 = smov 60   ;;  %v1065_v1 = vld [vmem:[%s2198_s0 + $0x6e] sm:$0x1]  }
  0x76   :  { %v12_v4 = vpop.permute.xlu0 %11   ;;  %v40_v6 = vpop.permute.xlu1 %39  }
  0x77   :  { %899 = vst.msk [vmem:[%s2199_s1 + $0x2] sm:$0x1] %vm13_vm3, %v12_v4   ;;  %vm132_vm3 = vcmask 966536  }
  0x78   :  { %900 = vst.msk [vmem:[%s2199_s1 + $0x1] sm:$0x1] %vm16_vm5, %v12_v4   ;;  %429 = vrot.lane.b32.xlu0 %v1009_v3, %s1319_s26  ;;  %436 = vrot.lane.b32.xlu1 %v1011_v5, %s1320_s2  ;;  %s1324_s26 = smov 64   ;;  %vm146_vm5 = vcmask 950136   ;;  %v1067_v3 = vld [vmem:[%s2198_s0 + $0x21] sm:$0x1]  }
  0x79   :  { %907 = vst.msk [vmem:[%s2199_s1 + $0x1] sm:$0x1] %vm23_vm2, %v40_v6   ;;  %vm125_vm2 = vcmask 974736   ;;  %v1069_v5 = vld [vmem:[%s2198_s0 + $0x54] sm:$0x1]   ;;  %s1354_s2 = smov 34  }
  0x7a   :  { %45 = vst.msk [vmem:[%s2199_s1] sm:$0x1] %vm44_vm6, %v40_v6   ;;  %v26_v8 = vpop.permute.xlu0 %25   ;;  %v53_v10 = vpop.permute.xlu1 %52   ;;  %vm153_vm6 = vcmask 941936  }
  0x7b   :  { %903 = vst.msk [vmem:[%s2199_s1 + $0x4] sm:$0x1] %vm27_vm1, %v26_v8   ;;  %vm119_vm1 = vcmask 982936  }
  0x7c   :  { %904 = vst.msk [vmem:[%s2199_s1 + $0x3] sm:$0x1] %vm30_vm7, %v26_v8   ;;  %443 = vrot.lane.b32.xlu0 %v1013_v7, %s1321_s11  ;;  %450 = vrot.lane.b32.xlu1 %v1015_v9, %s1322_s16  ;;  %vm159_vm7 = vcmask 933736   ;;  %s1339_s16 = smov 49   ;;  %s1350_s11 = smov 38  }
  0x7d   :  { %910 = vst.msk [vmem:[%s2199_s1 + $0x3] sm:$0x1] %vm9_vm0, %v53_v10   ;;  %vm112_vm0 = vcmask 991136   ;;  %v1071_v7 = vld [vmem:[%s2198_s0 + $0x7] sm:$0x1]  }
  0x7e   :  { %911 = vst.msk [vmem:[%s2199_s1 + $0x2] sm:$0x1] %vm57_vm8, %v53_v10   ;;  %v63_v12 = vpop.permute.xlu0 %62   ;;  %v70_v14 = vpop.permute.xlu1 %69   ;;  %vm166_vm8 = vcmask 925536   ;;  %v1072_v9 = vld [vmem:[%s2198_s0 + $0x3a] sm:$0x1]  }
  0x7f   :  { %913 = vst.msk [vmem:[%s2199_s1 + $0x4] sm:$0x1] %vm64_vm9, %v63_v12   ;;  %vm173_vm9 = vcmask 917336  }
  0x80   :  { %457 = vrot.lane.b32.xlu0 %v1017_v11, %s1323_s23  ;;  %915 = vst.msk [vmem:[%s2199_s1 + $0x1] sm:$0x1] %vm71_vm10, %v70_v14   ;;  %463 = vrot.lane.b32.xlu1 %v1018_v13, %s1324_s26  ;;  %vm180_vm10 = vcmask 909136   ;;  %s1341_s26 = smov 47   ;;  %v1074_v11 = vld [vmem:[%s2198_s0 + $0x6d] sm:$0x1]  }
  0x81   :  { %v1076_v13 = vld [vmem:[%s2198_s0 + $0x20] sm:$0x1]   ;;  %s1364_s23 = smov 24  }
  0x82   :  { %v77_v16 = vpop.permute.xlu0 %76   ;;  %v84_v18 = vpop.permute.xlu1 %83  }
  0x83   :  { %917 = vst.msk [vmem:[%s2199_s1 + $0x3] sm:$0x1] %vm78_vm11, %v77_v16   ;;  %vm187_vm11 = vcmask 900936  }
  0x84   :  { %470 = vrot.lane.b32.xlu0 %v1020_v15, %s1325_s4  ;;  %86 = vst.msk [vmem:[%s2199_s1] sm:$0x1] %vm85_vm12, %v84_v18   ;;  %477 = vrot.lane.b32.xlu1 %v1022_v17, %s1326_s7  ;;  %vm193_vm12 = vcmask 892736   ;;  %s1343_s7 = smov 45   ;;  %v1078_v15 = vld [vmem:[%s2198_s0 + $0x53] sm:$0x1]  }
  0x85   :  { %v1080_v17 = vld [vmem:[%s2198_s0 + $0x6] sm:$0x1]   ;;  %s1366_s4 = smov 22  }
  0x86   :  { %v90_v20 = vpop.permute.xlu0 %89   ;;  %v97_v22 = vpop.permute.xlu1 %96  }
  0x87   :  { %920 = vst.msk [vmem:[%s2199_s1 + $0x2] sm:$0x1] %vm91_vm13, %v90_v20   ;;  %vm200_vm13 = vcmask 884536  }
  0x88   :  { %484 = vrot.lane.b32.xlu0 %v1024_v19, %s1327_s14  ;;  %922 = vst.msk [vmem:[%s2199_s1 + $0x4] sm:$0x1] %vm98_vm14, %v97_v22   ;;  %491 = vrot.lane.b32.xlu1 %v1026_v21, %s1328_s17  ;;  %vm207_vm14 = vcmask 876336   ;;  %s1345_s17 = smov 43   ;;  %v1081_v19 = vld [vmem:[%s2198_s0 + $0x39] sm:$0x1]  }
  0x89   :  { %v1083_v21 = vld [vmem:[%s2198_s0 + $0x6c] sm:$0x1]   ;;  %s1368_s14 = smov 20  }
  0x8a   :  { %v104_v24 = vpop.permute.xlu0 %103   ;;  %v111_v26 = vpop.permute.xlu1 %110  }
  0x8b   :  { %924 = vst.msk [vmem:[%s2199_s1 + $0x1] sm:$0x1] %vm105_vm15, %v104_v24   ;;  %vm214_vm15 = vcmask 868136  }
  0x8c   :  { %497 = vrot.lane.b32.xlu0 %v1027_v23, %s1329_s24  ;;  %926 = vst.msk [vmem:[%s2199_s1 + $0x3] sm:$0x1] %vm112_vm0, %v111_v26   ;;  %504 = vrot.lane.b32.xlu1 %v1029_v25, %s1330_s27  ;;  %vm221_vm0 = vcmask 859936   ;;  %s1347_s27 = smov 41   ;;  %v1085_v23 = vld [vmem:[%s2198_s0 + $0x1f] sm:$0x1]  }
  0x8d   :  { %v1087_v25 = vld [vmem:[%s2198_s0 + $0x52] sm:$0x1]   ;;  %s1370_s24 = smov 18  }
  0x8e   :  { %v118_v28 = vpop.permute.xlu0 %117   ;;  %v124_v30 = vpop.permute.xlu1 %123  }
  0x8f   :  { %120 = vst.msk [vmem:[%s2199_s1] sm:$0x1] %vm119_vm1, %v118_v28   ;;  %vm227_vm1 = vcmask 851736  }
  0x90   :  { %511 = vrot.lane.b32.xlu0 %v1031_v27, %s1331_s5  ;;  %929 = vst.msk [vmem:[%s2199_s1 + $0x2] sm:$0x1] %vm125_vm2, %v124_v30   ;;  %518 = vrot.lane.b32.xlu1 %v1033_v29, %s1332_s8  ;;  %vm234_vm2 = vcmask 843536   ;;  %s1349_s8 = smov 39   ;;  %v1089_v27 = vld [vmem:[%s2198_s0 + $0x5] sm:$0x1]  }
  0x91   :  { %v1090_v29 = vld [vmem:[%s2198_s0 + $0x38] sm:$0x1]   ;;  %s1372_s5 = smov 16  }
  0x92   :  { %v131_v32 = vpop.permute.xlu0 %130   ;;  %v138_v34 = vpop.permute.xlu1 %137  }
  0x93   :  { %931 = vst.msk [vmem:[%s2199_s1 + $0x4] sm:$0x1] %vm132_vm3, %v131_v32   ;;  %vm241_vm3 = vcmask 835336  }
  0x94   :  { %525 = vrot.lane.b32.xlu0 %v1035_v31, %s1333_s15  ;;  %933 = vst.msk [vmem:[%s2199_s1 + $0x1] sm:$0x1] %vm139_vm4, %v138_v34   ;;  %531 = vrot.lane.b32.xlu1 %v1036_v33, %s1334_s18  ;;  %vm248_vm4 = vcmask 827136   ;;  %s1351_s18 = smov 37   ;;  %v1092_v31 = vld [vmem:[%s2198_s0 + $0x6b] sm:$0x1]  }
  0x95   :  { %v1094_v33 = vld [vmem:[%s2198_s0 + $0x1e] sm:$0x1]   ;;  %s1374_s15 = smov 14  }
  0x96   :  { %v145_v36 = vpop.permute.xlu0 %144   ;;  %v152_v38 = vpop.permute.xlu1 %151  }
  0x97   :  { %935 = vst.msk [vmem:[%s2199_s1 + $0x3] sm:$0x1] %vm146_vm5, %v145_v36   ;;  %vm255_vm5 = vcmask 818936  }
  0x98   :  { %538 = vrot.lane.b32.xlu0 %v1038_v35, %s1335_s25  ;;  %154 = vst.msk [vmem:[%s2199_s1] sm:$0x1] %vm153_vm6, %v152_v38   ;;  %545 = vrot.lane.b32.xlu1 %v1040_v37, %s1336_s28  ;;  %vm261_vm6 = vcmask 810736   ;;  %s1353_s28 = smov 35   ;;  %v1096_v35 = vld [vmem:[%s2198_s0 + $0x51] sm:$0x1]  }
  0x99   :  { %v1098_v37 = vld [vmem:[%s2198_s0 + $0x4] sm:$0x1]   ;;  %s1376_s25 = smov 12  }
  0x9a   :  { %v158_v40 = vpop.permute.xlu0 %157   ;;  %v165_v42 = vpop.permute.xlu1 %164  }
  0x9b   :  { %938 = vst.msk [vmem:[%s2199_s1 + $0x2] sm:$0x1] %vm159_vm7, %v158_v40   ;;  %vm268_vm7 = vcmask 802536  }
  0x9c   :  { %552 = vrot.lane.b32.xlu0 %v1042_v39, %s1337_s6  ;;  %940 = vst.msk [vmem:[%s2199_s1 + $0x4] sm:$0x1] %vm166_vm8, %v165_v42   ;;  %559 = vrot.lane.b32.xlu1 %v1044_v41, %s1338_s9  ;;  %vm275_vm8 = vcmask 794336   ;;  %s1355_s9 = smov 33   ;;  %v1099_v39 = vld [vmem:[%s2198_s0 + $0x37] sm:$0x1]  }
  0x9d   :  { %v1101_v41 = vld [vmem:[%s2198_s0 + $0x6a] sm:$0x1]   ;;  %s1378_s6 = smov 10  }
  0x9e   :  { %v172_v44 = vpop.permute.xlu0 %171   ;;  %v179_v46 = vpop.permute.xlu1 %178  }
  0x9f   :  { %942 = vst.msk [vmem:[%s2199_s1 + $0x1] sm:$0x1] %vm173_vm9, %v172_v44   ;;  %vm282_vm9 = vcmask 786136  }
  0xa0   :  { %565 = vrot.lane.b32.xlu0 %v1045_v43, %s1339_s16  ;;  %944 = vst.msk [vmem:[%s2199_s1 + $0x3] sm:$0x1] %vm180_vm10, %v179_v46   ;;  %572 = vrot.lane.b32.xlu1 %v1047_v45, %s1340_s19  ;;  %vm289_vm10 = vcmask 777936   ;;  %s1357_s19 = smov 31   ;;  %v1103_v43 = vld [vmem:[%s2198_s0 + $0x1d] sm:$0x1]  }
  0xa1   :  { %v1105_v45 = vld [vmem:[%s2198_s0 + $0x50] sm:$0x1]   ;;  %s1380_s16 = smov 8  }
  0xa2   :  { %v186_v48 = vpop.permute.xlu0 %185   ;;  %v192_v50 = vpop.permute.xlu1 %191  }
  0xa3   :  { %188 = vst.msk [vmem:[%s2199_s1] sm:$0x1] %vm187_vm11, %v186_v48   ;;  %vm295_vm11 = vcmask 769736  }
  0xa4   :  { %579 = vrot.lane.b32.xlu0 %v1049_v47, %s1341_s26  ;;  %947 = vst.msk [vmem:[%s2199_s1 + $0x2] sm:$0x1] %vm193_vm12, %v192_v50   ;;  %586 = vrot.lane.b32.xlu1 %v1051_v49, %s1342_s29  ;;  %vm302_vm12 = vcmask 761536   ;;  %s1359_s29 = smov 29   ;;  %v1107_v47 = vld [vmem:[%s2198_s0 + $0x3] sm:$0x1]  }
  0xa5   :  { %v1108_v49 = vld [vmem:[%s2198_s0 + $0x36] sm:$0x1]   ;;  %s1382_s26 = smov 6  }
  0xa6   :  { %v199_v52 = vpop.permute.xlu0 %198   ;;  %v206_v54 = vpop.permute.xlu1 %205  }
  0xa7   :  { %949 = vst.msk [vmem:[%s2199_s1 + $0x4] sm:$0x1] %vm200_vm13, %v199_v52   ;;  %vm309_vm13 = vcmask 753336  }
  0xa8   :  { %593 = vrot.lane.b32.xlu0 %v1053_v51, %s1343_s7  ;;  %951 = vst.msk [vmem:[%s2199_s1 + $0x1] sm:$0x1] %vm207_vm14, %v206_v54   ;;  %599 = vrot.lane.b32.xlu1 %v1054_v53, %s1344_s10  ;;  %vm316_vm14 = vcmask 745136   ;;  %s1361_s10 = smov 27   ;;  %v1110_v51 = vld [vmem:[%s2198_s0 + $0x69] sm:$0x1]  }
  0xa9   :  { %v1112_v53 = vld [vmem:[%s2198_s0 + $0x1c] sm:$0x1]   ;;  %s1384_s7 = smov 4  }
  0xaa   :  { %v213_v56 = vpop.permute.xlu0 %212   ;;  %v220_v58 = vpop.permute.xlu1 %219  }
  0xab   :  { %953 = vst.msk [vmem:[%s2199_s1 + $0x3] sm:$0x1] %vm214_vm15, %v213_v56   ;;  %vm323_vm15 = vcmask 736936  }
  0xac   :  { %606 = vrot.lane.b32.xlu0 %v1056_v55, %s1345_s17  ;;  %222 = vst.msk [vmem:[%s2199_s1] sm:$0x1] %vm221_vm0, %v220_v58   ;;  %613 = vrot.lane.b32.xlu1 %v1058_v57, %s1346_s20  ;;  %vm329_vm0 = vcmask 728736   ;;  %s1363_s20 = smov 25   ;;  %v1114_v55 = vld [vmem:[%s2198_s0 + $0x4f] sm:$0x1]  }
  0xad   :  { %v1116_v57 = vld [vmem:[%s2198_s0 + $0x2] sm:$0x1]   ;;  %s1386_s17 = smov 2  }
  0xae   :  { %v226_v60 = vpop.permute.xlu0 %225   ;;  %v233_v62 = vpop.permute.xlu1 %232  }
  0xaf   :  { %956 = vst.msk [vmem:[%s2199_s1 + $0x2] sm:$0x1] %vm227_vm1, %v226_v60   ;;  %vm336_vm1 = vcmask 720536  }
  0xb0   :  { %620 = vrot.lane.b32.xlu0 %v1060_v59, %s1347_s27  ;;  %958 = vst.msk [vmem:[%s2199_s1 + $0x4] sm:$0x1] %vm234_vm2, %v233_v62   ;;  %627 = vrot.lane.b32.xlu1 %v1062_v61, %s1348_s30  ;;  %vm343_vm2 = vcmask 712336   ;;  %s1365_s30 = smov 23   ;;  %v1117_v59 = vld [vmem:[%s2198_s0 + $0x35] sm:$0x1]  }
  0xb1   :  { %v1119_v61 = vld [vmem:[%s2198_s0 + $0x68] sm:$0x1]  }
  0xb2   :  { %v240_v0 = vpop.permute.xlu0 %239   ;;  %v247_v2 = vpop.permute.xlu1 %246  }
  0xb3   :  { %960 = vst.msk [vmem:[%s2199_s1 + $0x1] sm:$0x1] %vm241_vm3, %v240_v0   ;;  %vm350_vm3 = vcmask 704136  }
  0xb4   :  { %633 = vrot.lane.b32.xlu0 %v1063_v63, %s1349_s8  ;;  %962 = vst.msk [vmem:[%s2199_s1 + $0x3] sm:$0x1] %vm248_vm4, %v247_v2   ;;  %640 = vrot.lane.b32.xlu1 %v1065_v1, %s1350_s11  ;;  %vm357_vm4 = vcmask 695936   ;;  %s1367_s11 = smov 21   ;;  %v1121_v63 = vld [vmem:[%s2198_s0 + $0x1b] sm:$0x1]  }
  0xb5   :  { %v1123_v1 = vld [vmem:[%s2198_s0 + $0x4e] sm:$0x1]  }
  0xb6   :  { %v254_v4 = vpop.permute.xlu0 %253   ;;  %v260_v6 = vpop.permute.xlu1 %259  }
  0xb7   :  { %256 = vst.msk [vmem:[%s2199_s1] sm:$0x1] %vm255_vm5, %v254_v4   ;;  %vm363_vm5 = vcmask 687736  }
  0xb8   :  { %647 = vrot.lane.b32.xlu0 %v1067_v3, %s1351_s18  ;;  %965 = vst.msk [vmem:[%s2199_s1 + $0x2] sm:$0x1] %vm261_vm6, %v260_v6   ;;  %654 = vrot.lane.b32.xlu1 %v1069_v5, %s1352_s21  ;;  %vm370_vm6 = vcmask 679536   ;;  %s1369_s21 = smov 19   ;;  %v1125_v3 = vld [vmem:[%s2198_s0 + $0x1] sm:$0x1]  }
  0xb9   :  { %v1126_v5 = vld [vmem:[%s2198_s0 + $0x34] sm:$0x1]  }
  0xba   :  { %v267_v8 = vpop.permute.xlu0 %266   ;;  %v274_v10 = vpop.permute.xlu1 %273  }
  0xbb   :  { %967 = vst.msk [vmem:[%s2199_s1 + $0x4] sm:$0x1] %vm268_vm7, %v267_v8   ;;  %vm377_vm7 = vcmask 671336  }
  0xbc   :  { %661 = vrot.lane.b32.xlu0 %v1071_v7, %s1353_s28  ;;  %969 = vst.msk [vmem:[%s2199_s1 + $0x1] sm:$0x1] %vm275_vm8, %v274_v10   ;;  %667 = vrot.lane.b32.xlu1 %v1072_v9, %s1354_s2  ;;  %vm384_vm8 = vcmask 663136   ;;  %s1371_s2 = smov 17   ;;  %v1128_v7 = vld [vmem:[%s2198_s0 + $0x67] sm:$0x1]  }
  0xbd   :  { %v1130_v9 = vld [vmem:[%s2198_s0 + $0x1a] sm:$0x1]  }
  0xbe   :  { %v281_v12 = vpop.permute.xlu0 %280   ;;  %v288_v14 = vpop.permute.xlu1 %287  }
  0xbf   :  { %971 = vst.msk [vmem:[%s2199_s1 + $0x3] sm:$0x1] %vm282_vm9, %v281_v12   ;;  %vm391_vm9 = vcmask 654936  }
  0xc0   :  { %674 = vrot.lane.b32.xlu0 %v1074_v11, %s1355_s9  ;;  %290 = vst.msk [vmem:[%s2199_s1] sm:$0x1] %vm289_vm10, %v288_v14   ;;  %681 = vrot.lane.b32.xlu1 %v1076_v13, %s1356_s12  ;;  %vm397_vm10 = vcmask 646736   ;;  %s1373_s12 = smov 15   ;;  %v1132_v11 = vld [vmem:[%s2198_s0 + $0x4d] sm:$0x1]  }
  0xc2   :  { %v294_v16 = vpop.permute.xlu0 %293   ;;  %v301_v18 = vpop.permute.xlu1 %300  }
  0xc3   :  { %974 = vst.msk [vmem:[%s2199_s1 + $0x2] sm:$0x1] %vm295_vm11, %v294_v16   ;;  %vm404_vm11 = vcmask 638536  }
  0xc4   :  { %688 = vrot.lane.b32.xlu0 %v1078_v15, %s1357_s19  ;;  %976 = vst.msk [vmem:[%s2199_s1 + $0x4] sm:$0x1] %vm302_vm12, %v301_v18   ;;  %695 = vrot.lane.b32.xlu1 %v1080_v17, %s1358_s22  ;;  %vm411_vm12 = vcmask 630336   ;;  %s1375_s22 = smov 13  }
  0xc6   :  { %v308_v20 = vpop.permute.xlu0 %307   ;;  %v315_v22 = vpop.permute.xlu1 %314  }
  0xc7   :  { %978 = vst.msk [vmem:[%s2199_s1 + $0x1] sm:$0x1] %vm309_vm13, %v308_v20   ;;  %vm418_vm13 = vcmask 622136  }
  0xc8   :  { %701 = vrot.lane.b32.xlu0 %v1081_v19, %s1359_s29  ;;  %980 = vst.msk [vmem:[%s2199_s1 + $0x3] sm:$0x1] %vm316_vm14, %v315_v22   ;;  %708 = vrot.lane.b32.xlu1 %v1083_v21, %s1360_s3  ;;  %vm425_vm14 = vcmask 613936   ;;  %s1377_s3 = smov 11  }
  0xca   :  { %v322_v24 = vpop.permute.xlu0 %321   ;;  %v328_v26 = vpop.permute.xlu1 %327  }
  0xcb   :  { %324 = vst.msk [vmem:[%s2199_s1] sm:$0x1] %vm323_vm15, %v322_v24   ;;  %vm431_vm15 = vcmask 605736  }
  0xcc   :  { %715 = vrot.lane.b32.xlu0 %v1085_v23, %s1361_s10  ;;  %983 = vst.msk [vmem:[%s2199_s1 + $0x2] sm:$0x1] %vm329_vm0, %v328_v26   ;;  %722 = vrot.lane.b32.xlu1 %v1087_v25, %s1362_s13  ;;  %vm438_vm0 = vcmask 597536   ;;  %s1379_s13 = smov 9  }
  0xce   :  { %v335_v28 = vpop.permute.xlu0 %334   ;;  %v342_v30 = vpop.permute.xlu1 %341  }
  0xcf   :  { %985 = vst.msk [vmem:[%s2199_s1 + $0x4] sm:$0x1] %vm336_vm1, %v335_v28   ;;  %vm445_vm1 = vcmask 589336  }
  0xd0   :  { %729 = vrot.lane.b32.xlu0 %v1089_v27, %s1363_s20  ;;  %987 = vst.msk [vmem:[%s2199_s1 + $0x1] sm:$0x1] %vm343_vm2, %v342_v30   ;;  %735 = vrot.lane.b32.xlu1 %v1090_v29, %s1364_s23  ;;  %vm452_vm2 = vcmask 581136   ;;  %s1381_s23 = smov 7  }
  0xd2   :  { %v349_v32 = vpop.permute.xlu0 %348   ;;  %v356_v34 = vpop.permute.xlu1 %355  }
  0xd3   :  { %989 = vst.msk [vmem:[%s2199_s1 + $0x3] sm:$0x1] %vm350_vm3, %v349_v32   ;;  %vm459_vm3 = vcmask 572936  }
  0xd4   :  { %742 = vrot.lane.b32.xlu0 %v1092_v31, %s1365_s30  ;;  %358 = vst.msk [vmem:[%s2199_s1] sm:$0x1] %vm357_vm4, %v356_v34   ;;  %749 = vrot.lane.b32.xlu1 %v1094_v33, %s1366_s4  ;;  %vm465_vm4 = vcmask 564736   ;;  %s1383_s4 = smov 5  }
  0xd6   :  { %v362_v36 = vpop.permute.xlu0 %361   ;;  %v369_v38 = vpop.permute.xlu1 %368  }
  0xd7   :  { %992 = vst.msk [vmem:[%s2199_s1 + $0x2] sm:$0x1] %vm363_vm5, %v362_v36   ;;  %vm472_vm5 = vcmask 556536  }
  0xd8   :  { %756 = vrot.lane.b32.xlu0 %v1096_v35, %s1367_s11  ;;  %994 = vst.msk [vmem:[%s2199_s1 + $0x4] sm:$0x1] %vm370_vm6, %v369_v38   ;;  %763 = vrot.lane.b32.xlu1 %v1098_v37, %s1368_s14  ;;  %vm479_vm6 = vcmask 548336   ;;  %s1385_s14 = smov 3  }
  0xda   :  { %v376_v40 = vpop.permute.xlu0 %375   ;;  %v383_v42 = vpop.permute.xlu1 %382  }
  0xdb   :  { %996 = vst.msk [vmem:[%s2199_s1 + $0x1] sm:$0x1] %vm377_vm7, %v376_v40   ;;  %vm486_vm7 = vcmask 540136  }
  0xdc   :  { %769 = vrot.lane.b32.xlu0 %v1099_v39, %s1369_s21  ;;  %998 = vst.msk [vmem:[%s2199_s1 + $0x3] sm:$0x1] %vm384_vm8, %v383_v42   ;;  %776 = vrot.lane.b32.xlu1 %v1101_v41, %s1370_s24  ;;  %vm493_vm8 = vcmask 531936   ;;  %s1387_s21 = smov 1  }
  0xde   :  { %v390_v44 = vpop.permute.xlu0 %389   ;;  %v396_v46 = vpop.permute.xlu1 %395  }
  0xdf   :  { %392 = vst.msk [vmem:[%s2199_s1] sm:$0x1] %vm391_vm9, %v390_v44   ;;  %vm499_vm9 = vcmask 523736  }
  0xe0   :  { %783 = vrot.lane.b32.xlu0 %v1103_v43, %s1371_s2  ;;  %1001 = vst.msk [vmem:[%s2199_s1 + $0x2] sm:$0x1] %vm397_vm10, %v396_v46   ;;  %790 = vrot.lane.b32.xlu1 %v1105_v45, %s1372_s5  ;;  %vm506_vm10 = vcmask 515536  }
  0xe2   :  { %v403_v48 = vpop.permute.xlu0 %402   ;;  %v410_v50 = vpop.permute.xlu1 %409  }
  0xe3   :  { %1003 = vst.msk [vmem:[%s2199_s1 + $0x4] sm:$0x1] %vm404_vm11, %v403_v48   ;;  %vm513_vm11 = vcmask 507336  }
  0xe4   :  { %797 = vrot.lane.b32.xlu0 %v1107_v47, %s1373_s12  ;;  %1005 = vst.msk [vmem:[%s2199_s1 + $0x1] sm:$0x1] %vm411_vm12, %v410_v50   ;;  %803 = vrot.lane.b32.xlu1 %v1108_v49, %s1374_s15  ;;  %vm520_vm12 = vcmask 499136  }
  0xe6   :  { %v417_v52 = vpop.permute.xlu0 %416   ;;  %v424_v54 = vpop.permute.xlu1 %423  }
  0xe7   :  { %1007 = vst.msk [vmem:[%s2199_s1 + $0x3] sm:$0x1] %vm418_vm13, %v417_v52   ;;  %vm527_vm13 = vcmask 490936  }
  0xe8   :  { %810 = vrot.lane.b32.xlu0 %v1110_v51, %s1375_s22  ;;  %426 = vst.msk [vmem:[%s2199_s1] sm:$0x1] %vm425_vm14, %v424_v54   ;;  %817 = vrot.lane.b32.xlu1 %v1112_v53, %s1376_s25  ;;  %vm533_vm14 = vcmask 482736  }
  0xea   :  { %v430_v56 = vpop.permute.xlu0 %429   ;;  %v437_v58 = vpop.permute.xlu1 %436  }
  0xeb   :  { %1010 = vst.msk [vmem:[%s2199_s1 + $0x2] sm:$0x1] %vm431_vm15, %v430_v56   ;;  %vm540_vm15 = vcmask 474536  }
  0xec   :  { %824 = vrot.lane.b32.xlu0 %v1114_v55, %s1377_s3  ;;  %1012 = vst.msk [vmem:[%s2199_s1 + $0x4] sm:$0x1] %vm438_vm0, %v437_v58   ;;  %831 = vrot.lane.b32.xlu1 %v1116_v57, %s1378_s6  ;;  %vm547_vm0 = vcmask 466336  }
  0xee   :  { %v444_v60 = vpop.permute.xlu0 %443   ;;  %v451_v62 = vpop.permute.xlu1 %450  }
  0xef   :  { %1014 = vst.msk [vmem:[%s2199_s1 + $0x1] sm:$0x1] %vm445_vm1, %v444_v60   ;;  %vm554_vm1 = vcmask 458136  }
  0xf0   :  { %837 = vrot.lane.b32.xlu0 %v1117_v59, %s1379_s13  ;;  %1016 = vst.msk [vmem:[%s2199_s1 + $0x3] sm:$0x1] %vm452_vm2, %v451_v62   ;;  %844 = vrot.lane.b32.xlu1 %v1119_v61, %s1380_s16  ;;  %vm561_vm2 = vcmask 449936  }
  0xf2   :  { %v458_v0 = vpop.permute.xlu0 %457   ;;  %v464_v2 = vpop.permute.xlu1 %463  }
  0xf3   :  { %460 = vst.msk [vmem:[%s2199_s1] sm:$0x1] %vm459_vm3, %v458_v0   ;;  %vm567_vm3 = vcmask 441736  }
  0xf4   :  { %851 = vrot.lane.b32.xlu0 %v1121_v63, %s1381_s23  ;;  %1019 = vst.msk [vmem:[%s2199_s1 + $0x2] sm:$0x1] %vm465_vm4, %v464_v2   ;;  %858 = vrot.lane.b32.xlu1 %v1123_v1, %s1382_s26  ;;  %vm574_vm4 = vcmask 433536  }
  0xf6   :  { %v471_v4 = vpop.permute.xlu0 %470   ;;  %v478_v6 = vpop.permute.xlu1 %477  }
  0xf7   :  { %1021 = vst.msk [vmem:[%s2199_s1 + $0x4] sm:$0x1] %vm472_vm5, %v471_v4   ;;  %vm581_vm5 = vcmask 425336  }
  0xf8   :  { %865 = vrot.lane.b32.xlu0 %v1125_v3, %s1383_s4  ;;  %1023 = vst.msk [vmem:[%s2199_s1 + $0x1] sm:$0x1] %vm479_vm6, %v478_v6   ;;  %871 = vrot.lane.b32.xlu1 %v1126_v5, %s1384_s7  ;;  %vm588_vm6 = vcmask 417136  }
  0xfa   :  { %v485_v8 = vpop.permute.xlu0 %484   ;;  %v492_v10 = vpop.permute.xlu1 %491  }
  0xfb   :  { %1025 = vst.msk [vmem:[%s2199_s1 + $0x3] sm:$0x1] %vm486_vm7, %v485_v8   ;;  %vm595_vm7 = vcmask 408936  }
  0xfc   :  { %878 = vrot.lane.b32.xlu0 %v1128_v7, %s1385_s14  ;;  %494 = vst.msk [vmem:[%s2199_s1] sm:$0x1] %vm493_vm8, %v492_v10   ;;  %885 = vrot.lane.b32.xlu1 %v1130_v9, %s1386_s17  ;;  %vm601_vm8 = vcmask 400736  }
  0xfe   :  { %v498_v12 = vpop.permute.xlu0 %497   ;;  %v505_v13 = vpop.permute.xlu1 %504  }
  0xff   :  { %1028 = vst.msk [vmem:[%s2199_s1 + $0x2] sm:$0x1] %vm499_vm9, %v498_v12   ;;  %vm608_vm9 = vcmask 392536  }
 0x100   :  { %892 = vrot.lane.b32.xlu0 %v1132_v11, %s1387_s21  ;;  %1030 = vst.msk [vmem:[%s2199_s1 + $0x4] sm:$0x1] %vm506_vm10, %v505_v13   ;;  %vm615_vm10 = vcmask 384336  }
 0x102   :  { %v512_v14 = vpop.permute.xlu0 %511   ;;  %v519_v15 = vpop.permute.xlu1 %518  }
 0x103   :  { %1032 = vst.msk [vmem:[%s2199_s1 + $0x1] sm:$0x1] %vm513_vm11, %v512_v14   ;;  %vm622_vm11 = vcmask 376136  }
 0x104   :  { %1034 = vst.msk [vmem:[%s2199_s1 + $0x3] sm:$0x1] %vm520_vm12, %v519_v15   ;;  %vm629_vm12 = vcmask 367936  }
 0x106   :  { %v526_v16 = vpop.permute.xlu0 %525   ;;  %v532_v17 = vpop.permute.xlu1 %531  }
 0x107   :  { %528 = vst.msk [vmem:[%s2199_s1] sm:$0x1] %vm527_vm13, %v526_v16   ;;  %vm635_vm13 = vcmask 359736  }
 0x108   :  { %1037 = vst.msk [vmem:[%s2199_s1 + $0x2] sm:$0x1] %vm533_vm14, %v532_v17   ;;  %vm642_vm14 = vcmask 351536  }
 0x10a   :  { %v539_v18 = vpop.permute.xlu0 %538   ;;  %v546_v19 = vpop.permute.xlu1 %545  }
 0x10b   :  { %1039 = vst.msk [vmem:[%s2199_s1 + $0x4] sm:$0x1] %vm540_vm15, %v539_v18   ;;  %vm649_vm15 = vcmask 343336  }
 0x10c   :  { %1041 = vst.msk [vmem:[%s2199_s1 + $0x1] sm:$0x1] %vm547_vm0, %v546_v19   ;;  %vm656_vm0 = vcmask 335136  }
 0x10e   :  { %v553_v20 = vpop.permute.xlu0 %552   ;;  %v560_v21 = vpop.permute.xlu1 %559  }
 0x10f   :  { %1043 = vst.msk [vmem:[%s2199_s1 + $0x3] sm:$0x1] %vm554_vm1, %v553_v20   ;;  %vm663_vm1 = vcmask 326936  }
 0x110   :  { %562 = vst.msk [vmem:[%s2199_s1] sm:$0x1] %vm561_vm2, %v560_v21   ;;  %vm669_vm2 = vcmask 318736  }
 0x112   :  { %v566_v22 = vpop.permute.xlu0 %565   ;;  %v573_v23 = vpop.permute.xlu1 %572  }
 0x113   :  { %1046 = vst.msk [vmem:[%s2199_s1 + $0x2] sm:$0x1] %vm567_vm3, %v566_v22   ;;  %vm676_vm3 = vcmask 310536  }
 0x114   :  { %1048 = vst.msk [vmem:[%s2199_s1 + $0x4] sm:$0x1] %vm574_vm4, %v573_v23   ;;  %vm683_vm4 = vcmask 302336  }
 0x116   :  { %v580_v24 = vpop.permute.xlu0 %579   ;;  %v587_v25 = vpop.permute.xlu1 %586  }
 0x117   :  { %1050 = vst.msk [vmem:[%s2199_s1 + $0x1] sm:$0x1] %vm581_vm5, %v580_v24   ;;  %vm690_vm5 = vcmask 294136  }
 0x118   :  { %1052 = vst.msk [vmem:[%s2199_s1 + $0x3] sm:$0x1] %vm588_vm6, %v587_v25   ;;  %vm697_vm6 = vcmask 285936  }
 0x11a   :  { %v594_v26 = vpop.permute.xlu0 %593   ;;  %v600_v27 = vpop.permute.xlu1 %599  }
 0x11b   :  { %596 = vst.msk [vmem:[%s2199_s1] sm:$0x1] %vm595_vm7, %v594_v26   ;;  %vm703_vm7 = vcmask 277736  }
 0x11c   :  { %1055 = vst.msk [vmem:[%s2199_s1 + $0x2] sm:$0x1] %vm601_vm8, %v600_v27   ;;  %vm710_vm8 = vcmask 269536  }
 0x11e   :  { %v607_v28 = vpop.permute.xlu0 %606   ;;  %v614_v29 = vpop.permute.xlu1 %613  }
 0x11f   :  { %1057 = vst.msk [vmem:[%s2199_s1 + $0x4] sm:$0x1] %vm608_vm9, %v607_v28   ;;  %vm717_vm9 = vcmask 261336  }
 0x120   :  { %1059 = vst.msk [vmem:[%s2199_s1 + $0x1] sm:$0x1] %vm615_vm10, %v614_v29   ;;  %vm724_vm10 = vcmask 253136  }
 0x122   :  { %v621_v30 = vpop.permute.xlu0 %620   ;;  %v628_v31 = vpop.permute.xlu1 %627  }
 0x123   :  { %1061 = vst.msk [vmem:[%s2199_s1 + $0x3] sm:$0x1] %vm622_vm11, %v621_v30   ;;  %vm731_vm11 = vcmask 244936  }
 0x124   :  { %630 = vst.msk [vmem:[%s2199_s1] sm:$0x1] %vm629_vm12, %v628_v31   ;;  %vm737_vm12 = vcmask 236736  }
 0x126   :  { %v634_v32 = vpop.permute.xlu0 %633   ;;  %v641_v33 = vpop.permute.xlu1 %640  }
 0x127   :  { %1064 = vst.msk [vmem:[%s2199_s1 + $0x2] sm:$0x1] %vm635_vm13, %v634_v32   ;;  %vm744_vm13 = vcmask 228536  }
 0x128   :  { %1066 = vst.msk [vmem:[%s2199_s1 + $0x4] sm:$0x1] %vm642_vm14, %v641_v33   ;;  %vm751_vm14 = vcmask 220336  }
 0x12a   :  { %v648_v34 = vpop.permute.xlu0 %647   ;;  %v655_v35 = vpop.permute.xlu1 %654  }
 0x12b   :  { %1068 = vst.msk [vmem:[%s2199_s1 + $0x1] sm:$0x1] %vm649_vm15, %v648_v34   ;;  %vm758_vm15 = vcmask 212136  }
 0x12c   :  { %1070 = vst.msk [vmem:[%s2199_s1 + $0x3] sm:$0x1] %vm656_vm0, %v655_v35   ;;  %vm765_vm0 = vcmask 203936  }
 0x12e   :  { %v662_v36 = vpop.permute.xlu0 %661   ;;  %v668_v37 = vpop.permute.xlu1 %667  }
 0x12f   :  { %664 = vst.msk [vmem:[%s2199_s1] sm:$0x1] %vm663_vm1, %v662_v36   ;;  %vm771_vm1 = vcmask 195736  }
 0x130   :  { %1073 = vst.msk [vmem:[%s2199_s1 + $0x2] sm:$0x1] %vm669_vm2, %v668_v37   ;;  %vm778_vm2 = vcmask 187536  }
 0x132   :  { %v675_v38 = vpop.permute.xlu0 %674   ;;  %v682_v39 = vpop.permute.xlu1 %681  }
 0x133   :  { %1075 = vst.msk [vmem:[%s2199_s1 + $0x4] sm:$0x1] %vm676_vm3, %v675_v38   ;;  %vm785_vm3 = vcmask 179336  }
 0x134   :  { %1077 = vst.msk [vmem:[%s2199_s1 + $0x1] sm:$0x1] %vm683_vm4, %v682_v39   ;;  %vm792_vm4 = vcmask 171136  }
 0x136   :  { %v689_v40 = vpop.permute.xlu0 %688   ;;  %v696_v41 = vpop.permute.xlu1 %695  }
 0x137   :  { %1079 = vst.msk [vmem:[%s2199_s1 + $0x3] sm:$0x1] %vm690_vm5, %v689_v40   ;;  %vm799_vm5 = vcmask 162936  }
 0x138   :  { %698 = vst.msk [vmem:[%s2199_s1] sm:$0x1] %vm697_vm6, %v696_v41   ;;  %vm805_vm6 = vcmask 154736  }
 0x13a   :  { %v702_v42 = vpop.permute.xlu0 %701   ;;  %v709_v43 = vpop.permute.xlu1 %708  }
 0x13b   :  { %1082 = vst.msk [vmem:[%s2199_s1 + $0x2] sm:$0x1] %vm703_vm7, %v702_v42   ;;  %vm812_vm7 = vcmask 146536  }
 0x13c   :  { %1084 = vst.msk [vmem:[%s2199_s1 + $0x4] sm:$0x1] %vm710_vm8, %v709_v43   ;;  %vm819_vm8 = vcmask 138336  }
 0x13e   :  { %v716_v44 = vpop.permute.xlu0 %715   ;;  %v723_v45 = vpop.permute.xlu1 %722  }
 0x13f   :  { %1086 = vst.msk [vmem:[%s2199_s1 + $0x1] sm:$0x1] %vm717_vm9, %v716_v44   ;;  %vm826_vm9 = vcmask 130136  }
 0x140   :  { %1088 = vst.msk [vmem:[%s2199_s1 + $0x3] sm:$0x1] %vm724_vm10, %v723_v45   ;;  %vm833_vm10 = vcmask 121936  }
 0x142   :  { %v730_v46 = vpop.permute.xlu0 %729   ;;  %v736_v47 = vpop.permute.xlu1 %735  }
 0x143   :  { %732 = vst.msk [vmem:[%s2199_s1] sm:$0x1] %vm731_vm11, %v730_v46   ;;  %vm839_vm11 = vcmask 113736  }
 0x144   :  { %1091 = vst.msk [vmem:[%s2199_s1 + $0x2] sm:$0x1] %vm737_vm12, %v736_v47   ;;  %vm846_vm12 = vcmask 105536  }
 0x146   :  { %v743_v48 = vpop.permute.xlu0 %742   ;;  %v750_v49 = vpop.permute.xlu1 %749  }
 0x147   :  { %1093 = vst.msk [vmem:[%s2199_s1 + $0x4] sm:$0x1] %vm744_vm13, %v743_v48   ;;  %vm853_vm13 = vcmask 97336  }
 0x148   :  { %1095 = vst.msk [vmem:[%s2199_s1 + $0x1] sm:$0x1] %vm751_vm14, %v750_v49   ;;  %vm860_vm14 = vcmask 89136  }
 0x14a   :  { %v757_v50 = vpop.permute.xlu0 %756   ;;  %v764_v51 = vpop.permute.xlu1 %763  }
 0x14b   :  { %1097 = vst.msk [vmem:[%s2199_s1 + $0x3] sm:$0x1] %vm758_vm15, %v757_v50   ;;  %vm867_vm15 = vcmask 80936  }
 0x14c   :  { %766 = vst.msk [vmem:[%s2199_s1] sm:$0x1] %vm765_vm0, %v764_v51   ;;  %vm873_vm0 = vcmask 72736  }
 0x14e   :  { %v770_v52 = vpop.permute.xlu0 %769   ;;  %v777_v53 = vpop.permute.xlu1 %776  }
 0x14f   :  { %1100 = vst.msk [vmem:[%s2199_s1 + $0x2] sm:$0x1] %vm771_vm1, %v770_v52   ;;  %vm880_vm1 = vcmask 64536  }
 0x150   :  { %1102 = vst.msk [vmem:[%s2199_s1 + $0x4] sm:$0x1] %vm778_vm2, %v777_v53   ;;  %vm887_vm2 = vcmask 56336  }
 0x152   :  { %v784_v54 = vpop.permute.xlu0 %783   ;;  %v791_v55 = vpop.permute.xlu1 %790  }
 0x153   :  { %1104 = vst.msk [vmem:[%s2199_s1 + $0x1] sm:$0x1] %vm785_vm3, %v784_v54   ;;  %vm894_vm3 = vcmask 48136  }
 0x154   :  { %1106 = vst.msk [vmem:[%s2199_s1 + $0x3] sm:$0x1] %vm792_vm4, %v791_v55  }
 0x156   :  { %v798_v56 = vpop.permute.xlu0 %797   ;;  %v804_v57 = vpop.permute.xlu1 %803  }
 0x157   :  { %800 = vst.msk [vmem:[%s2199_s1] sm:$0x1] %vm799_vm5, %v798_v56  }
 0x158   :  { %1109 = vst.msk [vmem:[%s2199_s1 + $0x2] sm:$0x1] %vm805_vm6, %v804_v57  }
 0x15a   :  { %v811_v58 = vpop.permute.xlu0 %810   ;;  %v818_v59 = vpop.permute.xlu1 %817  }
 0x15b   :  { %1111 = vst.msk [vmem:[%s2199_s1 + $0x4] sm:$0x1] %vm812_vm7, %v811_v58  }
 0x15c   :  { %1113 = vst.msk [vmem:[%s2199_s1 + $0x1] sm:$0x1] %vm819_vm8, %v818_v59  }
 0x15e   :  { %v825_v60 = vpop.permute.xlu0 %824   ;;  %v832_v61 = vpop.permute.xlu1 %831  }
 0x15f   :  { %1115 = vst.msk [vmem:[%s2199_s1 + $0x3] sm:$0x1] %vm826_vm9, %v825_v60  }
 0x160   :  { %834 = vst.msk [vmem:[%s2199_s1] sm:$0x1] %vm833_vm10, %v832_v61  }
 0x162   :  { %v838_v62 = vpop.permute.xlu0 %837   ;;  %v845_v63 = vpop.permute.xlu1 %844  }
 0x163   :  { %1118 = vst.msk [vmem:[%s2199_s1 + $0x2] sm:$0x1] %vm839_vm11, %v838_v62  }
 0x164   :  { %1120 = vst.msk [vmem:[%s2199_s1 + $0x4] sm:$0x1] %vm846_vm12, %v845_v63  }
 0x166   :  { %v852_v0 = vpop.permute.xlu0 %851   ;;  %v859_v1 = vpop.permute.xlu1 %858  }
 0x167   :  { %1122 = vst.msk [vmem:[%s2199_s1 + $0x1] sm:$0x1] %vm853_vm13, %v852_v0  }
 0x168   :  { %1124 = vst.msk [vmem:[%s2199_s1 + $0x3] sm:$0x1] %vm860_vm14, %v859_v1  }
 0x16a   :  { %v866_v2 = vpop.permute.xlu0 %865   ;;  %v872_v3 = vpop.permute.xlu1 %871  }
 0x16b   :  { %868 = vst.msk [vmem:[%s2199_s1] sm:$0x1] %vm867_vm15, %v866_v2  }
 0x16c   :  { %1127 = vst.msk [vmem:[%s2199_s1 + $0x2] sm:$0x1] %vm873_vm0, %v872_v3  }
 0x16e   :  { %v879_v4 = vpop.permute.xlu0 %878   ;;  %v886_v5 = vpop.permute.xlu1 %885  }
 0x16f   :  { %1129 = vst.msk [vmem:[%s2199_s1 + $0x4] sm:$0x1] %vm880_vm1, %v879_v4  }
 0x170   :  { %1131 = vst.msk [vmem:[%s2199_s1 + $0x1] sm:$0x1] %vm887_vm2, %v886_v5  }
 0x172   :  { %v893_v6 = vpop.permute.xlu0 %892  }
 0x173   :  { %1133 = vst.msk [vmem:[%s2199_s1 + $0x3] sm:$0x1] %vm894_vm3, %v893_v6  }

// kernel: mlp_learner_forward.1
= control target key start
LH: loop header
LB: loop body
LE: loop exit
PB: predicated region body
PF: predicated region fallthrough
CT: control target
= control target key end

     0   :  { %vm36_vm0 = vcmask 261120   ;;  %v675_v0 = vmov 0.0|0.0   ;;  %vm676_vm2 = vmmov 0   ;;  %v677_v4 = vmov 0.0   ;;  %s850_s0 = inlined_call_operand.vmem [shape: f32[128,32], index: 0, kind: input, shape index: {}]   ;;  %s851_s1 = inlined_call_operand.vmem [shape: f32[8,512], index: 1, kind: input, shape index: {}]   ;;  %s852_s3 = inlined_call_operand.vmem [shape: f32[8,128], index: 3, kind: output, shape index: {1}]   ;;  %s853_s2 = inlined_call_operand.vmem [shape: f32[128,128], index: 2, kind: output, shape index: {0}]  }
   0x1   :  { %636 = vmatprep.subr.bf16.mxu0 %v675_v0  ;;  %v14_v1 = vld [vmem:[%s850_s0] sm:$0xff]  ;;  %v15_v2 = vld [vmem:[%s850_s0 + $0x8] sm:$0xff]  ;;  %vm707_vm1 = vmpackc.low %vm36_vm0, %vm36_vm0  ;;  %602 = vmatprep.mubr.msk.f32.mxu0 %vm676_vm2, %v677_v4  ;;  %v678_v6 = vmov 0   ;;  %vm166_vm3 = vcmask 64512  }
   0x2   :  { %v637_v5 = vpack.c.bf16 %v15_v2, %v14_v1  ;;  %672 = vset.pattern.permute.xlu0 %v678_v6  ;;  %605 = vmatprep.subr.mxu1 %v677_v4  ;;  %v16_v7 = vld [vmem:[%s850_s0 + $0x10] sm:$0xff]  ;;  %v17_v8 = vld [vmem:[%s850_s0 + $0x18] sm:$0xff]  ;;  %v30_v9 = vld [vmem:[%s851_s1 + $0x8] sm:$0xff] }
   0x3   :  { %607 = vmatprep.mubr.msk.f32.mxu1 %vm676_vm2, %v677_v4  ;;  %v641_v10 = vpack.c.bf16 %v17_v8, %v16_v7  ;;  %33 = vperm.xlu0 %672, %v30_v9   ;;  %v160_v11 = vld [vmem:[%s851_s1 + $0x18] sm:$0xff]  ;;  %v18_v12 = vld [vmem:[%s850_s0 + $0x20] sm:$0xff]  ;;  %v19_v13 = vld [vmem:[%s850_s0 + $0x28] sm:$0xff] }
   0x4   :  { %639 = vmatpush3.bf16.xpose.msk.msra.mxu0 %vm707_vm1, %v637_v5  ;;  %v645_v14 = vpack.c.bf16 %v19_v13, %v18_v12  ;;  %v20_v15 = vld [vmem:[%s850_s0 + $0x30] sm:$0xff]  ;;  %v21_v16 = vld [vmem:[%s850_s0 + $0x38] sm:$0xff]  ;;  %v22_v18 = vld [vmem:[%s850_s0 + $0x40] sm:$0xff] }
   0x5   :  { %640 = vmatprep.subr.bf16.mxu0 %v675_v0  ;;  %v649_v17 = vpack.c.bf16 %v21_v16, %v20_v15  ;;  %v23_v19 = vld [vmem:[%s850_s0 + $0x48] sm:$0xff]  ;;  %v24_v21 = vld [vmem:[%s850_s0 + $0x50] sm:$0xff]  ;;  %v25_v22 = vld [vmem:[%s850_s0 + $0x58] sm:$0xff] }
   0x6   :  { %v653_v20 = vpack.c.bf16 %v23_v19, %v22_v18  ;;  %v657_v23 = vpack.c.bf16 %v25_v22, %v24_v21  ;;  %v26_v24 = vld [vmem:[%s850_s0 + $0x60] sm:$0xff]  ;;  %v27_v25 = vld [vmem:[%s850_s0 + $0x68] sm:$0xff]  ;;  %v28_v27 = vld [vmem:[%s850_s0 + $0x70] sm:$0xff] }
   0x7   :  { %163 = vperm.xlu0 %672, %v160_v11   ;;  %v661_v26 = vpack.c.bf16 %v27_v25, %v26_v24  ;;  %v29_v28 = vld [vmem:[%s850_s0 + $0x78] sm:$0xff]  ;;  %v13_v30 = vld [vmem:[%s851_s1] sm:$0xff]  ;;  %v159_v36 = vld [vmem:[%s851_s1 + $0x10] sm:$0xff] }
   0x8   :  { %v665_v29 = vpack.c.bf16 %v29_v28, %v28_v27 }
   0xc   :  { %643 = vmatpush3.bf16.xpose.msk.msra.mxu0 %vm707_vm1, %v641_v10 }
   0xd   :  { %644 = vmatprep.subr.bf16.mxu0 %v675_v0 }
  0x14   :  { %647 = vmatpush3.bf16.xpose.msk.msra.mxu0 %vm707_vm1, %v645_v14 }
  0x15   :  { %648 = vmatprep.subr.bf16.mxu0 %v675_v0 }
  0x1c   :  { %651 = vmatpush3.bf16.xpose.msk.msra.mxu0 %vm707_vm1, %v649_v17 }
  0x1d   :  { %652 = vmatprep.subr.bf16.mxu0 %v675_v0 }
  0x24   :  { %655 = vmatpush3.bf16.xpose.msk.msra.mxu0 %vm707_vm1, %v653_v20 }
  0x25   :  { %656 = vmatprep.subr.bf16.mxu0 %v675_v0 }
  0x2c   :  { %659 = vmatpush3.bf16.xpose.msk.msra.mxu0 %vm707_vm1, %v657_v23 }
  0x2d   :  { %660 = vmatprep.subr.bf16.mxu0 %v675_v0 }
  0x34   :  { %663 = vmatpush3.bf16.xpose.msk.msra.mxu0 %vm707_vm1, %v661_v26 }
  0x35   :  { %664 = vmatprep.subr.bf16.mxu0 %v675_v0 }
  0x3c   :  { %667 = vmatpush3.bf16.xpose.msk.msra.mxu0 %vm707_vm1, %v665_v29 }
  0x43   :  { %603 = vmatmul.mubr.msk.f32.vlgmr.msra.gmra.mrb[0].mxu0 %vm36_vm0, %v13_v30 }
  0x82   :  { %v34_v31 = vpop.permute.xlu0 %33 }
  0x86   :  { %v164_v37 = vpop.permute.xlu0 %163 }
 0x116   :  { %v154_v32 = vpop.f32.mrb[0].mxu0 }
 0x117   :  { %v155_v33 = vadd.f32 %v154_v32, %v34_v31  ;;  %v604_v34 = vpop.f32.mrb[1].mxu0 }
 0x119   :  { %v158_v35 = vmax.f32 %v155_v33, 0.0 }
 0x11b   :  { %606 = vmatpush3.msra.mxu1 %v158_v35 }
 0x11c   :  { %608 = vmatmul.mubr.msk.f32.vlgmr.msra.gmra.mrb[0].mxu1 %vm166_vm3, %v159_v36 }
 0x1ef   :  { %v236_v38 = vpop.f32.mrb[0].mxu1 }
 0x1f0   :  { %v237_v39 = vadd.f32 %v236_v38, %v164_v37  ;;  %v609_v40 = vpop.f32.mrb[1].mxu1 }
 0x1f2   :  { %240 = vst [vmem:[%s852_s3] sm:$0xff] %v237_v39  ;;  %v241_v41 = vmul.f32 %v237_v39, %v237_v39 }
 0x1f4   :  { %v242_v42 = vrot.slane %v241_v41, 4 }
 0x1f6   :  { %v243_v43 = vadd.f32 %v242_v42, %v241_v41 }
 0x1f8   :  { %v244_v44 = vrot.slane %v243_v43, 2 }
 0x1fa   :  { %v245_v45 = vadd.f32 %v244_v44, %v243_v43 }
 0x1fc   :  { %v246_v46 = vrot.slane %v245_v45, 1 }
 0x1fe   :  { %v247_v47 = vadd.f32 %v246_v46, %v245_v45 }
 0x200   :  { %v248_v48 = vmax.f32 %v247_v47, 1e-24 }
 0x202   :  { %673 = vrsqrt.f32 %v248_v48 }
 0x20c   :  { %v674_v49 = vpop.eup %673 }
 0x20d   :  { %v250_v50 = vmul.f32 %v674_v49, %v237_v39 }
 0x20f   :  { %251 = vxpose.xlu1.b32.start.end [1/1] (short) %v250_v50, 128  ;;  %610 = vmatprep.subr.mxu1 %v250_v50 }
 0x210   :  { %611 = vmatpush3.msra.mxu1 %v250_v50 }
 0x28f   :  { %v267_v51 = vpop.trf.xlu1 }
 0x290   :  { %612 = vmatprep.mubr.msk.f32.mxu1 %vm166_vm3, %v267_v51 }
 0x293   :  { %v268_v52 = vpop.trf.xlu1 }
 0x294   :  { %613 = vmatmul.mubr.msk.f32.vlgmr.msra.gmra.mrb[2].mxu1 %vm166_vm3, %v268_v52 }
 0x297   :  { %v269_v53 = vpop.trf.xlu1 }
 0x298   :  { %615 = vmatprep.mubr.msk.f32.mxu1 %vm166_vm3, %v269_v53 }
 0x29b   :  { %v270_v54 = vpop.trf.xlu1 }
 0x29c   :  { %616 = vmatmul.mubr.msk.f32.gmra.mrb[4].mxu1 %vm166_vm3, %v270_v54 }
 0x29f   :  { %v271_v55 = vpop.trf.xlu1 }
 0x2a0   :  { %618 = vmatprep.mubr.msk.f32.mxu1 %vm166_vm3, %v271_v55 }
 0x2a3   :  { %v272_v56 = vpop.trf.xlu1 }
 0x2a4   :  { %619 = vmatmul.mubr.msk.f32.gmra.mrb[6].mxu1 %vm166_vm3, %v272_v56 }
 0x2a7   :  { %v273_v57 = vpop.trf.xlu1 }
 0x2a8   :  { %621 = vmatprep.mubr.msk.f32.mxu1 %vm166_vm3, %v273_v57 }
 0x2ab   :  { %v274_v58 = vpop.trf.xlu1 }
 0x2ac   :  { %622 = vmatmul.mubr.msk.f32.gmra.mrb[8].mxu1 %vm166_vm3, %v274_v58 }
 0x2af   :  { %v275_v59 = vpop.trf.xlu1 }
 0x2b0   :  { %624 = vmatprep.mubr.msk.f32.mxu1 %vm166_vm3, %v275_v59 }
 0x2b3   :  { %v276_v60 = vpop.trf.xlu1 }
 0x2b4   :  { %625 = vmatmul.mubr.msk.f32.gmra.mrb[10].mxu1 %vm166_vm3, %v276_v60 }
 0x2b7   :  { %v277_v61 = vpop.trf.xlu1 }
 0x2b8   :  { %627 = vmatprep.mubr.msk.f32.mxu1 %vm166_vm3, %v277_v61 }
 0x2bb   :  { %v278_v62 = vpop.trf.xlu1 }
 0x2bc   :  { %628 = vmatmul.mubr.msk.f32.gmra.mrb[12].mxu1 %vm166_vm3, %v278_v62 }
 0x2bf   :  { %v279_v63 = vpop.trf.xlu1 }
 0x2c0   :  { %630 = vmatprep.mubr.msk.f32.mxu1 %vm166_vm3, %v279_v63 }
 0x2c3   :  { %v280_v0 = vpop.trf.xlu1 }
 0x2c4   :  { %631 = vmatmul.mubr.msk.f32.gmra.mrb[14].mxu1 %vm166_vm3, %v280_v0 }
 0x2c7   :  { %v281_v1 = vpop.trf.xlu1 }
 0x2c8   :  { %633 = vmatprep.mubr.msk.f32.mxu1 %vm166_vm3, %v281_v1 }
 0x2cb   :  { %v282_v2 = vpop.trf.xlu1 }
 0x2cc   :  { %634 = vmatmul.mubr.msk.f32.gmra.mrb[16].mxu1 %vm166_vm3, %v282_v2 }
 0x367   :  { %v614_v3 = vpop.f32.mrb[2].mxu1 }
 0x368   :  { %477 = vst [vmem:[%s853_s2 + $0x8] sm:$0xff] %v614_v3  ;;  %v397_v4 = vpop.f32.mrb[3].mxu1 }
 0x369   :  { %476 = vst [vmem:[%s853_s2] sm:$0xff] %v397_v4 }
 0x36f   :  { %v617_v5 = vpop.f32.mrb[4].mxu1 }
 0x370   :  { %479 = vst [vmem:[%s853_s2 + $0x18] sm:$0xff] %v617_v5  ;;  %v407_v6 = vpop.f32.mrb[5].mxu1 }
 0x371   :  { %478 = vst [vmem:[%s853_s2 + $0x10] sm:$0xff] %v407_v6 }
 0x377   :  { %v620_v7 = vpop.f32.mrb[6].mxu1 }
 0x378   :  { %481 = vst [vmem:[%s853_s2 + $0x28] sm:$0xff] %v620_v7  ;;  %v417_v8 = vpop.f32.mrb[7].mxu1 }
 0x379   :  { %480 = vst [vmem:[%s853_s2 + $0x20] sm:$0xff] %v417_v8 }
 0x37f   :  { %v623_v9 = vpop.f32.mrb[8].mxu1 }
 0x380   :  { %483 = vst [vmem:[%s853_s2 + $0x38] sm:$0xff] %v623_v9  ;;  %v427_v10 = vpop.f32.mrb[9].mxu1 }
 0x381   :  { %482 = vst [vmem:[%s853_s2 + $0x30] sm:$0xff] %v427_v10 }
 0x387   :  { %v626_v11 = vpop.f32.mrb[10].mxu1 }
 0x388   :  { %485 = vst [vmem:[%s853_s2 + $0x48] sm:$0xff] %v626_v11  ;;  %v437_v12 = vpop.f32.mrb[11].mxu1 }
 0x389   :  { %484 = vst [vmem:[%s853_s2 + $0x40] sm:$0xff] %v437_v12 }
 0x38f   :  { %v629_v13 = vpop.f32.mrb[12].mxu1 }
 0x390   :  { %487 = vst [vmem:[%s853_s2 + $0x58] sm:$0xff] %v629_v13  ;;  %v447_v14 = vpop.f32.mrb[13].mxu1 }
 0x391   :  { %486 = vst [vmem:[%s853_s2 + $0x50] sm:$0xff] %v447_v14 }
 0x397   :  { %v632_v15 = vpop.f32.mrb[14].mxu1 }
 0x398   :  { %489 = vst [vmem:[%s853_s2 + $0x68] sm:$0xff] %v632_v15  ;;  %v457_v16 = vpop.f32.mrb[15].mxu1 }
 0x399   :  { %488 = vst [vmem:[%s853_s2 + $0x60] sm:$0xff] %v457_v16 }
 0x39f   :  { %v635_v17 = vpop.f32.mrb[16].mxu1 }
 0x3a0   :  { %491 = vst [vmem:[%s853_s2 + $0x78] sm:$0xff] %v635_v17  ;;  %v467_v18 = vpop.f32.mrb[17].mxu1 }
 0x3a1   :  { %490 = vst [vmem:[%s853_s2 + $0x70] sm:$0xff] %v467_v18 }

</bundles_post_ra>
